<compile_context>
chip_gen: v6e
topology: v6e:2x2x1
jax: 0.10.0
libtpu: 0.0.40
codegen_flags: <defaults>
</compile_context>

<pallas_src>
import functools

import jax
import jax.numpy as jnp
from jax.experimental import pallas as pl
from jax.experimental.pallas import tpu as pltpu


# ---------------------------------------------------------------------------
# Interpolation weight matrices (match PyTorch F.interpolate bilinear,
# align_corners=False along one axis).
# ---------------------------------------------------------------------------
def _bilinear_matrix(out_size: int, in_size: int, dtype=jnp.float32) -> jnp.ndarray:
    if out_size == in_size:
        return jnp.eye(out_size, dtype=dtype)
    scale = in_size / out_size
    i = jnp.arange(out_size, dtype=jnp.float32)
    src = (i + 0.5) * scale - 0.5
    src = jnp.maximum(src, 0.0)                      # PyTorch clamps negative src to 0
    i0 = jnp.floor(src).astype(jnp.int32)
    i0 = jnp.minimum(i0, in_size - 1)
    i1 = jnp.minimum(i0 + 1, in_size - 1)
    w1 = src - i0.astype(jnp.float32)
    w0 = 1.0 - w1
    rows = jnp.arange(out_size)
    mat = jnp.zeros((out_size, in_size), dtype=dtype)
    mat = mat.at[rows, i0].add(w0)
    mat = mat.at[rows, i1].add(w1)                   # i0 == i1 at the border -> weights sum to 1
    return mat


# ---------------------------------------------------------------------------
# Pallas kernel: whole channel block interpolated with two fused MXU matmuls.
# ---------------------------------------------------------------------------
def _interp_kernel(pos_ref, aht_ref, awt_ref, out_ref):
    # pos_ref: (CB, H, W) param dtype   aht_ref: (H, Hp) f32   awt_ref: (W, Wp) f32
    # out_ref: (CB, Hp, Wp) param dtype
    cb, h, w = pos_ref.shape
    hp = aht_ref.shape[1]
    wp = awt_ref.shape[1]

    # 0) single minor-dims swap (XLU) of the input block; f32 so all in-kernel relayouts
    #    use the lowering already proven on this stack.
    p = jnp.transpose(pos_ref[...].astype(jnp.float32), (0, 2, 1))      # (CB, W, H)

    # 1) contract H for the whole channel block in ONE MXU matmul
    #    (leading-dim merge: layout-free).
    t = jnp.dot(p.reshape(cb * w, h), aht_ref[...],
                preferred_element_type=jnp.float32)                      # (CB*W, Hp)

    # 2) second minor-dims swap (XLU): (CB, W, Hp) -> (CB, Hp, W)
    t = jnp.transpose(t.reshape(cb, w, hp), (0, 2, 1))

    # 3) contract W in ONE MXU matmul (leading-dim merge: layout-free).
    o = jnp.dot(t.reshape(cb * hp, w), awt_ref[...],
                preferred_element_type=jnp.float32)                      # (CB*Hp, Wp)

    # 4) leading-dim split (layout-free), cast to output dtype, store.
    out_ref[...] = o.reshape(cb, hp, wp).astype(out_ref.dtype)


# ---------------------------------------------------------------------------
# Block sizing (tile-padded VMEM accounting) + per-generation VMEM limit.
# ---------------------------------------------------------------------------
_TARGET_GRID_STEPS = 8          # ~8 steps: hides prologue/epilogue DMA on v5e/v6e,
                                # >=4 total so v7x's 2 TCs each see >=2 parallel steps.


@functools.lru_cache(maxsize=1)
def _vmem_limit_bytes() -> int:
    """Scoped-VMEM window: half the physical VMEM, capped at 64 MiB (32 MiB fallback)."""
    cap = None
    get_info = getattr(pltpu, "get_tpu_info", None)
    if get_info is not None:
        try:
            info = get_info()
            cap = getattr(info, "vmem_capacity_bytes", None)
            if cap is None:
                cap = getattr(info, "vmem_size_bytes", None)
        except Exception:
            cap = None
    if not cap:
        cap = 64 * 1024 * 1024
    return int(min(64 * 1024 * 1024, max(32 * 1024 * 1024, cap // 2)))


def _padded_bytes(second_minor: int, minor: int, itemsize: int) -> int:
    """Bytes one (second_minor, minor) slab occupies in VMEM after (sublane,128) tiling."""
    sublane = 8 * max(1, 4 // itemsize)              # f32: 8, bf16: 16, int8: 32
    pad_s = -(-second_minor // sublane) * sublane
    pad_m = -(-minor // 128) * 128
    return pad_s * pad_m * itemsize


def _pick_channel_block(dim, H, W, Hp, Wp, itemsize, vmem_limit):
    """Largest divisor of dim fitting half the VMEM window and giving ~TARGET grid steps."""
    f32 = 4
    per_ch = (
        2 * _padded_bytes(H, W, itemsize)            # double-buffered input block
        + 2 * _padded_bytes(Hp, Wp, itemsize)        # double-buffered output block
        + _padded_bytes(W, H, f32)                   # f32 cast/transposed input
        + _padded_bytes(W, Hp, f32)                  # matmul-1 result
        + _padded_bytes(Hp, W, f32)                  # transposed intermediate
        + _padded_bytes(Hp, Wp, f32)                 # matmul-2 result
    )
    budget = vmem_limit // 2                         # headroom for weights/compiler scratch
    cap_vmem = max(1, budget // per_ch)
    cap_steps = max(1, dim // _TARGET_GRID_STEPS)    # keep >= ~TARGET steps in the grid
    cap = min(cap_vmem, cap_steps)
    best = 1
    for cb in range(1, dim + 1):
        if dim % cb == 0 and cb <= cap:
            best = cb
    return best


# ---------------------------------------------------------------------------
# pallas_call wrapper (pos_embed is the single source of truth; no cached copies).
# ---------------------------------------------------------------------------
@functools.partial(jax.jit, static_argnames=("channel_block", "vmem_limit_bytes"))
def _interpolate_pos(pos, aht, awt, *, channel_block, vmem_limit_bytes):
    dim, H, W = pos.shape
    Hp = aht.shape[1]
    Wp = awt.shape[1]
    cb = channel_block
    return pl.pallas_call(
        _interp_kernel,
        out_shape=jax.ShapeDtypeStruct((dim, Hp, Wp), pos.dtype),
        grid=(dim // cb,),
        in_specs=[
            pl.BlockSpec((cb, H, W), lambda c: (c, 0, 0)),   # channel block, full spatial
            pl.BlockSpec((H, Hp), lambda c: (0, 0)),         # A_h^T, broadcast to every step
            pl.BlockSpec((W, Wp), lambda c: (0, 0)),         # A_w^T, broadcast to every step
        ],
        out_specs=pl.BlockSpec((cb, Hp, Wp), lambda c: (c, 0, 0)),
        compiler_params=pltpu.CompilerParams(
            dimension_semantics=("parallel",),
            vmem_limit_bytes=vmem_limit_bytes,
        ),
    )(pos, aht, awt)


# ---------------------------------------------------------------------------
# Module wrapper (JAX/Pallas port).
# ---------------------------------------------------------------------------
class PositionalEncodingLearned1d:
    """JAX/Pallas port of the learned 1d positional encoding.

    dtype defaults to bf16 (HBM-bound op: halves parameter read, output writeback and any
    downstream broadcast traffic; matmuls still accumulate in f32).  Use dtype=jnp.float32
    for exact parity with the PyTorch module.
    """

    def __init__(self, H=32, W=32, dim=768, key=None, dtype=jnp.bfloat16):
        self.H, self.W, self.dim = H, W, dim
        self.dtype = dtype
        if key is None:
            key = jax.random.PRNGKey(0)
        # trunc_normal_(std=0.02)
        self.pos_embed = (0.02 * jax.random.truncated_normal(
            key, -2.0, 2.0, (1, dim, H, W), dtype=jnp.float32)).astype(dtype)

    def __call__(self, B, Hp, Wp, mask=None, expand_batch=True):
        if mask is not None:
            # TODO(synk): masked branch needs per-sample dynamic interpolation sizes
            # (data-dependent output shapes); no clean Pallas equivalent.
            raise NotImplementedError("mask branch not supported in the Pallas port")

        if self.H == Hp and self.W == Wp:
            pos = self.pos_embed                                         # (1, dim, H, W)
        else:
            aht = _bilinear_matrix(Hp, self.H).T                         # (H, Hp) f32
            awt = _bilinear_matrix(Wp, self.W).T                         # (W, Wp) f32
            vmem_limit = _vmem_limit_bytes()
            cb = _pick_channel_block(self.dim, self.H, self.W, Hp, Wp,
                                     jnp.dtype(self.dtype).itemsize, vmem_limit)
            pos = _interpolate_pos(self.pos_embed[0], aht, awt,
                                   channel_block=cb,
                                   vmem_limit_bytes=vmem_limit)[None]    # (1, dim, Hp, Wp)

        if not expand_batch:
            # Avoid materializing B copies in HBM (that writeback would dwarf the kernel);
            # callers under jit can broadcast lazily / fuse into the consumer.
            return pos
        # NOTE: under jit this broadcast stays lazy; outside jit it materializes B copies.
        return jnp.broadcast_to(pos, (B, self.dim, Hp, Wp))


if __name__ == "__main__":
    # Small shapes: learned grid 8x8 with dim=32, queried at (Hp, Wp) = (16, 16), batch=2.
    key = jax.random.PRNGKey(0)

    B, Hp, Wp = 2, 16, 16

    # --- default bf16 path -------------------------------------------------
    module = PositionalEncodingLearned1d(H=8, W=8, dim=32, key=key)       # bf16
    out = jax.block_until_ready(module(B, Hp, Wp, mask=None))
    assert out.shape == (B, 32, Hp, Wp), out.shape

    ah = _bilinear_matrix(Hp, module.H)
    aw = _bilinear_matrix(Wp, module.W)
    ref = jnp.einsum("ph,chw,qw->cpq", ah,
                     module.pos_embed[0].astype(jnp.float32), aw)
    ref_b = jnp.broadcast_to(ref[None], (B, 32, Hp, Wp))
    assert jnp.allclose(out.astype(jnp.float32), ref_b, atol=2e-3, rtol=1e-2)

    # Non-expanded path returns the single (1, dim, Hp, Wp) result (no B-way writeback).
    out_1 = jax.block_until_ready(module(B, Hp, Wp, mask=None, expand_batch=False))
    assert out_1.shape == (1, 32, Hp, Wp)
    assert jnp.allclose(out_1[0].astype(jnp.float32), ref, atol=2e-3, rtol=1e-2)

    # Identity path (Hp, Wp) == (H, W): pure expand.
    out_id = jax.block_until_ready(module(B, 8, 8, mask=None))
    assert out_id.shape == (B, 32, 8, 8)
    assert jnp.array_equal(out_id[0], module.pos_embed[0])

    # --- f32 path: exact parity with the PyTorch-f32 module -----------------
    module_f32 = PositionalEncodingLearned1d(H=8, W=8, dim=32, key=key, dtype=jnp.float32)
    out_f32 = jax.block_until_ready(module_f32(B, Hp, Wp, mask=None))
    ref_f32 = jnp.einsum("ph,chw,qw->cpq", ah, module_f32.pos_embed[0], aw)
    assert jnp.allclose(out_f32[0], ref_f32, atol=1e-5, rtol=1e-5)

    print("KERNEL_OK")
</pallas_src>

<mosaic_0001>
module attributes {stable_mosaic.version = 11 : i64} {
  func.func @_interp_kernel(%arg0: i32, %arg1: memref<4x8x8xbf16, #tpu.memory_space<vmem>>, %arg2: memref<8x16xf32, #tpu.memory_space<vmem>>, %arg3: memref<8x16xf32, #tpu.memory_space<vmem>>, %arg4: memref<4x16x16xbf16, #tpu.memory_space<vmem>>) attributes {dimension_semantics = [#tpu.dimension_semantics<parallel>], iteration_bounds = array<i64: 8>, scalar_prefetch = 0 : i64, scratch_operands = 0 : i64, tpu.core_type = #tpu.core_type<tc>, window_params = [{transform_indices = @transform_0, window_bounds = array<i64: 4, 8, 8>}, {pipeline_mode = #tpu.pipeline_mode<synchronous>, transform_indices = @transform_1, window_bounds = array<i64: 8, 16>}, {pipeline_mode = #tpu.pipeline_mode<synchronous>, transform_indices = @transform_2, window_bounds = array<i64: 8, 16>}, {transform_indices = @transform_3, window_bounds = array<i64: 4, 16, 16>}]} {
    %c0 = arith.constant 0 : index
    %c0_0 = arith.constant 0 : index
    %c0_1 = arith.constant 0 : index
    %0 = vector.load %arg1[%c0, %c0_0, %c0_1] : memref<4x8x8xbf16, #tpu.memory_space<vmem>>, vector<4x8x8xbf16>
    %1 = arith.extf %0 : vector<4x8x8xbf16> to vector<4x8x8xf32>
    %2 = tpu.transpose %1, [0, 2, 1] : vector<4x8x8xf32> -> vector<4x8x8xf32>
    %3 = vector.shape_cast %2 : vector<4x8x8xf32> to vector<32x8xf32>
    %c0_2 = arith.constant 0 : index
    %c0_3 = arith.constant 0 : index
    %4 = vector.load %arg2[%c0_2, %c0_3] : memref<8x16xf32, #tpu.memory_space<vmem>>, vector<8x16xf32>
    %cst = arith.constant dense<0.000000e+00> : vector<32x16xf32>
    %5 = tpu.matmul %3, %4, %cst {dimension_numbers = #tpu.dot_dimension_numbers<[1], [0], [0], [1], [0, 0, 1, 1], [], []>} : vector<32x8xf32>, vector<8x16xf32>, vector<32x16xf32> -> vector<32x16xf32>
    %6 = vector.shape_cast %5 : vector<32x16xf32> to vector<4x8x16xf32>
    %7 = tpu.transpose %6, [0, 2, 1] : vector<4x8x16xf32> -> vector<4x16x8xf32>
    %8 = vector.shape_cast %7 : vector<4x16x8xf32> to vector<64x8xf32>
    %c0_4 = arith.constant 0 : index
    %c0_5 = arith.constant 0 : index
    %9 = vector.load %arg3[%c0_4, %c0_5] : memref<8x16xf32, #tpu.memory_space<vmem>>, vector<8x16xf32>
    %cst_6 = arith.constant dense<0.000000e+00> : vector<64x16xf32>
    %10 = tpu.matmul %8, %9, %cst_6 {dimension_numbers = #tpu.dot_dimension_numbers<[1], [0], [0], [1], [0, 0, 1, 1], [], []>} : vector<64x8xf32>, vector<8x16xf32>, vector<64x16xf32> -> vector<64x16xf32>
    %11 = vector.shape_cast %10 : vector<64x16xf32> to vector<4x16x16xf32>
    %12 = arith.truncf %11 : vector<4x16x16xf32> to vector<4x16x16xbf16>
    %c0_7 = arith.constant 0 : index
    %c0_8 = arith.constant 0 : index
    %c0_9 = arith.constant 0 : index
    %13 = vector.load %arg4[%c0_7, %c0_8, %c0_9] : memref<4x16x16xbf16, #tpu.memory_space<vmem>>, vector<4x16x16xbf16>
    tpu.vector_store %arg4[%c0_7, %c0_8, %c0_9], %12 {strides = array<i32>} : memref<4x16x16xbf16, #tpu.memory_space<vmem>>, vector<4x16x16xbf16>,
    return
  }
  func.func @transform_0(%arg0: i32) -> (i32, i32, i32) {
    %c0_i32 = arith.constant 0 : i32
    %c0_i32_0 = arith.constant 0 : i32
    %c0_i32_1 = arith.constant 0 : i32
    return %arg0, %c0_i32, %c0_i32_0 : i32, i32, i32
  }
  func.func @transform_1(%arg0: i32) -> (i32, i32) {
    %c0_i32 = arith.constant 0 : i32
    %c0_i32_0 = arith.constant 0 : i32
    %c0_i32_1 = arith.constant 0 : i32
    return %c0_i32, %c0_i32_0 : i32, i32
  }
  func.func @transform_2(%arg0: i32) -> (i32, i32) {
    %c0_i32 = arith.constant 0 : i32
    %c0_i32_0 = arith.constant 0 : i32
    %c0_i32_1 = arith.constant 0 : i32
    return %c0_i32, %c0_i32_0 : i32, i32
  }
  func.func @transform_3(%arg0: i32) -> (i32, i32, i32) {
    %c0_i32 = arith.constant 0 : i32
    %c0_i32_0 = arith.constant 0 : i32
    %c0_i32_1 = arith.constant 0 : i32
    return %arg0, %c0_i32, %c0_i32_0 : i32, i32, i32
  }
}

</mosaic_0001>

<bundles_post_ra>
// kernel: _interpolate_pos.1
= control target key start
LH: loop header
LB: loop body
LE: loop exit
PB: predicated region body
PF: predicated region fallthrough
CT: control target
= control target key end

     0   :  { %s907_s12 = smov 0   ;;  %s954_s0 = inlined_call_operand.vmem [shape: bf16[32,8,8], index: 0, kind: input, shape index: {}]   ;;  %s955_s1 = inlined_call_operand.vmem [shape: f32[8,16], index: 1, kind: input, shape index: {}]   ;;  %s956_s2 = inlined_call_operand.vmem [shape: f32[8,16], index: 2, kind: input, shape index: {}]   ;;  %s957_s3 = inlined_call_operand.vmem [shape: bf16[32,16,16], index: 3, kind: output, shape index: {}]  }
   0x1 LB: > { %s768_s13 = sadd.s32 4294967295, %s885_s12   ;;  %p772_p0 = scmp.ge.s32.totalorder %s885_s12, 1  ;;  %s885_s12 = sphi %s907_s12, %s13_s12  }
   0x2   : > { %p138_p1 = scmp.lt.s32.totalorder %s885_s12, 9 }
   0x4   : > { %p139_p2 = pnand %p772_p0, %p138_p1 }
   0x5   : > { %s773_s14 = sshll.u32 (!%p139_p2), %s768_s13, 2 }
   0x6   : > { %142 = sbr.rel (%p139_p2) target bundleno = 683 (0x2ab), region = 32  ;;  %p164_p3 = scmp.lt.s32.totalorder (!%p139_p2), %s773_s14, 31 }
   0xb   : > { %s959_s14 = smov (!%p164_p3, %s773_s14), 31  ;;  %v312_v6 = vld [vmem:[%s955_s1] sm:$0xff]  ;;  %vm313_vm0 = vcmask 64512   ;;  %vm701_vm1 = vcmask 125952  }
   0xc   : > { %s774_s15 = sshll.u32 %s959_s14, 2  ;;  %832 = vmatprep.subr.mxu0 %v312_v6  ;;  %v539_v15 = vld [vmem:[%s956_s2] sm:$0xff]  ;;  %s800_s23 = sshll.u32 %s959_s14, 3 }
   0xd   : > { %s167_s18 = scalar_lea.vmem %s954_s0, %s774_s15  ;;  %833 = vmatpush3.msra.mxu0 %v312_v6  ;;  %854 = vmatprep.subr.mxu1 %v539_v15  ;;  %s174_s26 = scalar_lea.vmem %s957_s3, %s800_s23 }
   0xe   : > { %v810_v0 = vld [vmem:[%s167_s18] sm:$0xff]   ;;  %v817_v1 = vld [vmem:[%s167_s18 + $0x8] sm:$0xff]   ;;  %840 = vmatprep.subr.mxu0 %v539_v15  ;;  %855 = vmatpush3.msra.mxu1 %v539_v15 }
   0xf   : > { %v811_v2 = vunpack.c.l.bf16 %v810_v0  ;;  %v812_v3 = vunpack.c.h.bf16 %v810_v0  ;;  %v815_v4 = vunpack.c.l.bf16 %v817_v1  ;;  %v816_v5 = vunpack.c.h.bf16 %v817_v1 }
  0x11   : > { %v865_v7 = vpack.i.bf16 %v812_v3, %v811_v2  ;;  %v872_v8 = vpack.i.bf16 %v816_v5, %v815_v4 }
  0x13   : > { %866 = vxpose.xlu0.b32.start.end [1/1] (short) (narrow) %v865_v7, 8 }
  0x17   : > { %873 = vxpose.xlu0.b32.start.end [1/1] (short) (narrow) %v872_v8, 8 }
  0x8f   : > { %v867_v9 = vpop.trf.xlu0 }
  0x90   : > { %v871_v10 = vunpack.i.h.bf16 %v867_v9  ;;  %v868_v11 = vunpack.i.l.bf16 %v867_v9 }
  0x92   : > { %834 = vmatprep.mubr.msk.f32.mxu0 %vm313_vm0, %v868_v11 }
  0x93   : > { %v874_v12 = vpop.trf.xlu0  ;;  %835 = vmatmul.mubr.msk.f32.vlgmr.msra.gmra.mxu0 %vm313_vm0, %v871_v10 }
  0x94   : > { %v878_v13 = vunpack.i.h.bf16 %v874_v12  ;;  %v875_v14 = vunpack.i.l.bf16 %v874_v12  ;;  %841 = vmatpush3.msra.mxu0 %v539_v15 }
  0x96   : > { %837 = vmatprep.mubr.msk.f32.mxu0 %vm313_vm0, %v875_v14 }
  0x97   : > { %838 = vmatmul.mubr.msk.f32.gmra.mxu0 %vm313_vm0, %v878_v13 }
 0x153   : > { %v836_v16 = vpop.f32.mrf.mxu0 }
 0x154   : > { %443 = vxpose.xlu1.b32.start.end [1/1] (short) (narrow) %v836_v16, 16 }
 0x155   : > { %v392_v17 = vpop.f32.mrf.mxu0 }
 0x156   : > { %411 = vxpose.xlu0.b32.start.end [1/1] (short) (narrow) %v392_v17, 16 }
 0x157   : > { %v839_v18 = vpop.f32.mrf.mxu0 }
 0x159   : > { %v402_v19 = vpop.f32.mrf.mxu0 }
 0x15a   : > { %475 = vxpose.xlu1.b32.start.end [1/1] (short) (narrow) %v402_v19, 16 }
 0x15f   : > { %507 = vxpose.xlu1.b32.start.end [1/1] (short) (narrow) %v839_v18, 16 }
 0x1d0   : > { %v459_v20 = vpop.trf.xlu1 }
 0x1d1   : > { %845 = vmatprep.mubr.msk.f32.mxu1 %vm313_vm0, %v459_v20 }
 0x1d2   : > { %v427_v21 = vpop.trf.xlu0 }
 0x1d3   : > { %842 = vmatprep.mubr.msk.f32.mxu0 %vm313_vm0, %v427_v21 }
 0x1d4   : > { %v460_v22 = vpop.trf.xlu1 }
 0x1d5   : > { %846 = vmatmul.mubr.msk.f32.vlgmr.msra.gmra.mxu1 %vm313_vm0, %v460_v22 }
 0x1d6   : > { %v428_v23 = vpop.trf.xlu0 }
 0x1d7   : > { %843 = vmatmul.mubr.msk.f32.vlgmr.msra.gmra.mxu0 %vm313_vm0, %v428_v23 }
 0x1d8   : > { %v491_v24 = vpop.trf.xlu1 }
 0x1d9   : > { %848 = vmatprep.mubr.msk.f32.mxu1 %vm313_vm0, %v491_v24 }
 0x1dc   : > { %v492_v25 = vpop.trf.xlu1 }
 0x1dd   : > { %849 = vmatmul.mubr.msk.f32.gmra.mxu1 %vm313_vm0, %v492_v25 }
 0x1e0   : > { %v523_v26 = vpop.trf.xlu1 }
 0x1e1   : > { %851 = vmatprep.mubr.msk.f32.mxu1 %vm313_vm0, %v523_v26 }
 0x1e4   : > { %v524_v27 = vpop.trf.xlu1 }
 0x1e5   : > { %852 = vmatmul.mubr.msk.f32.gmra.mxu1 %vm313_vm0, %v524_v27 }
 0x295   : > { %v847_v28 = vpop.f32.mrf.mxu1 }
 0x296   : > { %v804_v29 = vpack.c.bf16 %v847_v28, %v847_v28 }
 0x297   : > { %v640_v30 = vpop.f32.mrf.mxu1  ;;  %v844_v31 = vpop.f32.mrf.mxu0 }
 0x298   : > { %705 = vst.msk [vmem:[%s174_s26 + $0xc] sm:$0xf] %vm701_vm1, %v804_v29  ;;  %v803_v32 = vpack.c.bf16 %v640_v30, %v640_v30  ;;  %v802_v33 = vpack.c.bf16 %v844_v31, %v844_v31 }
 0x299   : > { %v630_v34 = vpop.f32.mrf.mxu0 }
 0x29a   : > { %704 = vst.msk [vmem:[%s174_s26 + $0x8] sm:$0xf] %vm701_vm1, %v803_v32  ;;  %703 = vst.msk [vmem:[%s174_s26 + $0x4] sm:$0xf] %vm701_vm1, %v802_v33  ;;  %v801_v35 = vpack.c.bf16 %v630_v34, %v630_v34 }
 0x29c   : > { %702 = vst.msk [vmem:[%s174_s26] sm:$0xf] %vm701_vm1, %v801_v35 }
 0x29d   : > { %v850_v36 = vpop.f32.mrf.mxu1 }
 0x29e   : > { %v806_v37 = vpack.c.bf16 %v850_v36, %v850_v36 }
 0x29f   : > { %v650_v38 = vpop.f32.mrf.mxu1 }
 0x2a0   : > { %707 = vst.msk [vmem:[%s174_s26 + $0x14] sm:$0xf] %vm701_vm1, %v806_v37  ;;  %v805_v39 = vpack.c.bf16 %v650_v38, %v650_v38 }
 0x2a2   : > { %706 = vst.msk [vmem:[%s174_s26 + $0x10] sm:$0xf] %vm701_vm1, %v805_v39 }
 0x2a5   : > { %v853_v40 = vpop.f32.mrf.mxu1 }
 0x2a6   : > { %v808_v41 = vpack.c.bf16 %v853_v40, %v853_v40 }
 0x2a7   : > { %v660_v42 = vpop.f32.mrf.mxu1 }
 0x2a8   : > { %709 = vst.msk [vmem:[%s174_s26 + $0x1c] sm:$0xf] %vm701_vm1, %v808_v41  ;;  %v807_v43 = vpack.c.bf16 %v660_v42, %v660_v42 }
 0x2aa   : > { %708 = vst.msk [vmem:[%s174_s26 + $0x18] sm:$0xf] %vm701_vm1, %v807_v43 }
 0x2ab PF: > { %s13_s12 = sadd.s32 1, %s885_s12  }
 0x2ac   : > { %p10_p4 = scmp.ge.s32.totalorder %s13_s12, 10  }
 0x2ae   :  { %12 = sbr.rel (!%p10_p4) target bundleno = 1 (0x1), region = 62 }

</bundles_post_ra>
